<compile_context>
chip_gen: v7x
topology: tpu7x:2x2x1
jax: 0.10.0
libtpu: 0.0.40
codegen_flags: <defaults>
</compile_context>

<pallas_src>
import functools

import jax
import jax.numpy as jnp
from jax import lax
from jax.experimental import pallas as pl
from jax.experimental.pallas import tpu as pltpu

MEL_PAD = 128           # 80 mel channels padded to a full lane tile
BN_EPS = 1e-5
_UNROLL_T = 64          # fully unroll LSTM time loop up to this length


def _vmem_limit_bytes():
    # v5e/v6e: 128 MiB physical VMEM -> generous limit; v7x (64 MiB): stay at 48 MiB.
    try:
        cap = int(pltpu.get_tpu_info().vmem_capacity_bytes)
    except Exception:
        return 48 * 1024 * 1024
    return 96 * 1024 * 1024 if cap >= 128 * 1024 * 1024 else 48 * 1024 * 1024


_VMEM_LIMIT = _vmem_limit_bytes()
_BLOCK_M = 1024 if _VMEM_LIMIT > 64 * 1024 * 1024 else 512


def _round_up(n, m=128):
    return ((n + m - 1) // m) * m


def _cparams(dims=None):
    return pltpu.CompilerParams(dimension_semantics=dims,
                                vmem_limit_bytes=_VMEM_LIMIT)


def _vmem_spec():
    return pl.BlockSpec(memory_space=pltpu.MemorySpace.VMEM)


# ----------------------------- Pallas kernels -----------------------------

def _matmul_bias_kernel(x_ref, w_ref, b_ref, o_ref):
    o_ref[...] = (
        jnp.dot(x_ref[...], w_ref[...], preferred_element_type=jnp.float32)
        + b_ref[...]
    ).astype(o_ref.dtype)


def matmul_bias(x, w, b, out_dtype=jnp.float32, block_m=None):
    """x (M,K)[bf16] @ w (K,N)[bf16] + b (1,N)[f32] -> (M,N), f32 accumulation."""
    block_m = _BLOCK_M if block_m is None else block_m
    M, K = x.shape
    N = w.shape[1]
    bm = M if M <= block_m else block_m
    grid = (pl.cdiv(M, bm),)
    return pl.pallas_call(
        _matmul_bias_kernel,
        out_shape=jax.ShapeDtypeStruct((M, N), out_dtype),
        grid=grid,
        in_specs=[
            pl.BlockSpec((bm, K), lambda i: (i, 0)),
            pl.BlockSpec((K, N), lambda i: (0, 0)),   # weight stays resident
            pl.BlockSpec((1, N), lambda i: (0, 0)),
        ],
        out_specs=pl.BlockSpec((bm, N), lambda i: (i, 0)),
        compiler_params=_cparams(("parallel",)),
    )(x, w, b)


def _conv1d_act_kernel(x_ref, w_ref, b_ref, o_ref, *, K, pad, act):
    # x_ref: (T, Cin) bf16 (one batch elem); w_ref: (K, Cin, Cout) bf16; b_ref: (1, Cout) f32
    T, Cin = x_ref.shape
    Cout = o_ref.shape[-1]
    x = x_ref[...]                                     # stays bf16
    z = jnp.zeros((pad, Cin), x.dtype)
    xp = jnp.concatenate([z, x, z], axis=0)            # (T + 2*pad, Cin), in-kernel 'same' pad
    acc = jnp.zeros((T, Cout), jnp.float32)
    for k in range(K):                                 # 5-tap accumulation -- no im2col buffer
        acc = acc + jnp.dot(xp[k:k + T, :], w_ref[k],
                            preferred_element_type=jnp.float32)
    y = acc + b_ref[...]
    if act == "relu":
        y = jnp.maximum(y, 0.0)
    elif act == "tanh":
        y = jnp.tanh(y)
    o_ref[...] = y.astype(o_ref.dtype)


def conv1d_bn_act(x, w, b, act, out_dtype=jnp.bfloat16):
    """Conv1d(k, 'same') with eval-mode BN folded into (w, b), + activation.

    x: (B, T, Cin) bf16   w: (K, Cin, Cout) bf16   b: (1, Cout) f32
    """
    B, T, Cin = x.shape
    K, _, Cout = w.shape
    kern = functools.partial(_conv1d_act_kernel, K=K, pad=(K - 1) // 2, act=act)
    return pl.pallas_call(
        kern,
        out_shape=jax.ShapeDtypeStruct((B, T, Cout), out_dtype),
        grid=(B,),
        in_specs=[
            pl.BlockSpec((None, T, Cin), lambda bb: (bb, 0, 0)),
            pl.BlockSpec((K, Cin, Cout), lambda bb: (0, 0, 0)),   # weights resident
            pl.BlockSpec((1, Cout), lambda bb: (0, 0)),
        ],
        out_specs=pl.BlockSpec((None, T, Cout), lambda bb: (bb, 0, 0)),
        compiler_params=_cparams(("parallel",)),
    )(x, w, b)


def _lstm_cell(g, c, H):
    # PyTorch gate order i, f, g, o.  g: (rows, 4H) f32, c: (rows, H) f32.
    i = jax.nn.sigmoid(g[:, 0 * H:1 * H])
    f = jax.nn.sigmoid(g[:, 1 * H:2 * H])
    gg = jnp.tanh(g[:, 2 * H:3 * H])
    o = jax.nn.sigmoid(g[:, 3 * H:4 * H])
    c = f * c + i * gg
    h = o * jnp.tanh(c)
    return h, c


def _lstm_kernel(xg_ref, whh_ref, o_ref):
    # xg_ref: (B, T, 4H) f32 pre-gates = x @ W_ih + b ; whh_ref: (H, 4H) bf16
    B, T, H = o_ref.shape
    w = whh_ref[...]
    h = jnp.zeros((B, H), jnp.float32)
    c = jnp.zeros((B, H), jnp.float32)
    if T <= _UNROLL_T:   # fully unrolled, static indices
        for t in range(T):
            g = xg_ref[:, t, :] + jnp.dot(h.astype(w.dtype), w,
                                          preferred_element_type=jnp.float32)
            h, c = _lstm_cell(g, c, H)
            o_ref[:, t, :] = h.astype(o_ref.dtype)
    else:
        def body(t, carry):
            h, c = carry
            xt = xg_ref[:, pl.ds(t, 1), :].reshape(B, 4 * H)
            g = xt + jnp.dot(h.astype(w.dtype), w, preferred_element_type=jnp.float32)
            h, c = _lstm_cell(g, c, H)
            o_ref[:, pl.ds(t, 1), :] = h.reshape(B, 1, H).astype(o_ref.dtype)
            return (h, c)
        lax.fori_loop(0, T, body, (h, c), unroll=8)


def _bilstm_kernel(xg_ref, wbd_ref, o_ref):
    # Fused fwd+bwd recurrence.
    #   xg_ref : (B, T, 8H) f32 pre-gates; [:, :, :4H] = fwd, [:, :, 4H:] = bwd
    #   wbd_ref: (2H, 8H) bf16 block-diagonal recurrent weights (Wf top-left, Wb bottom-right)
    #   o_ref  : (B, T, 2H);  [:, :, :H] = fwd hidden, [:, :, H:] = bwd hidden
    B, T, H2 = o_ref.shape
    H = H2 // 2
    w = wbd_ref[...]
    h = jnp.zeros((2 * B, H), jnp.float32)   # rows [:B] = fwd, [B:] = bwd
    c = jnp.zeros((2 * B, H), jnp.float32)

    def step(t, h, c, static):
        tb = T - 1 - t
        # Single MXU push per step: (B, 2H) @ (2H, 8H) block-diagonal.
        h_cat = jnp.concatenate([h[:B], h[B:]], axis=-1)          # (B, 2H)
        r = jnp.dot(h_cat.astype(w.dtype), w,
                    preferred_element_type=jnp.float32)            # (B, 8H)
        if static:
            xf = xg_ref[:, t, 0:4 * H]
            xb = xg_ref[:, tb, 4 * H:8 * H]
        else:
            xf = xg_ref[:, pl.ds(t, 1), 0:4 * H].reshape(B, 4 * H)
            xb = xg_ref[:, pl.ds(tb, 1), 4 * H:8 * H].reshape(B, 4 * H)
        # Pack both directions along the sublane (batch) axis -> one cell pass.
        g = jnp.concatenate([xf + r[:, 0:4 * H], xb + r[:, 4 * H:8 * H]], axis=0)
        return _lstm_cell(g, c, H)

    if T <= _UNROLL_T:
        for t in range(T):
            h, c = step(t, h, c, True)
            o_ref[:, t, 0:H] = h[:B].astype(o_ref.dtype)
            o_ref[:, T - 1 - t, H:2 * H] = h[B:].astype(o_ref.dtype)
    else:
        def body(t, carry):
            h, c = carry
            h, c = step(t, h, c, False)
            o_ref[:, pl.ds(t, 1), 0:H] = h[:B].reshape(B, 1, H).astype(o_ref.dtype)
            o_ref[:, pl.ds(T - 1 - t, 1), H:2 * H] = h[B:].reshape(B, 1, H).astype(o_ref.dtype)
            return (h, c)
        lax.fori_loop(0, T, body, (h, c), unroll=8)


def lstm_layer(x, w_ih, w_hh, b, out_dtype=jnp.bfloat16):
    """Single-direction LSTM (PyTorch gate order i,f,g,o), h0=c0=0. (B,T,D)->(B,T,H)."""
    B, T, Din = x.shape
    H = w_hh.shape[0]
    xg = matmul_bias(x.reshape(B * T, Din), w_ih, b,
                     out_dtype=jnp.float32).reshape(B, T, 4 * H)
    return pl.pallas_call(
        _lstm_kernel,
        out_shape=jax.ShapeDtypeStruct((B, T, H), out_dtype),
        in_specs=[_vmem_spec()] * 2,
        out_specs=_vmem_spec(),
        compiler_params=_cparams(),
    )(xg, w_hh)


def bilstm_layer(x, p, out_dtype=jnp.bfloat16):
    """One bidirectional LSTM layer; fwd/bwd pre-gate matmuls and recurrence fused."""
    B, T, Din = x.shape
    H = p["w_bd"].shape[0] // 2
    xg = matmul_bias(x.reshape(B * T, Din), p["w_ih"], p["b"],
                     out_dtype=jnp.float32).reshape(B, T, 8 * H)
    return pl.pallas_call(
        _bilstm_kernel,
        out_shape=jax.ShapeDtypeStruct((B, T, 2 * H), out_dtype),
        in_specs=[_vmem_spec()] * 2,
        out_specs=_vmem_spec(),
        compiler_params=_cparams(),
    )(xg, p["w_bd"])


# ----------------------------- parameter init -----------------------------

def _uniform(key, shape, scale):
    return jax.random.uniform(key, shape, jnp.float32, minval=-scale, maxval=scale)


def init_conv_bn(key, cin, cout, ksize=5, cin_pad=None, cout_pad=None):
    """Conv1d weight/bias with eval-mode BatchNorm folded in; channel dims padded."""
    cin_pad = cin if cin_pad is None else cin_pad
    cout_pad = cout if cout_pad is None else cout_pad
    kw, kb = jax.random.split(key)
    fan_in, fan_out = cin * ksize, cout * ksize
    w = _uniform(kw, (ksize, cin, cout), (6.0 / (fan_in + fan_out)) ** 0.5)
    cb = _uniform(kb, (cout,), 1.0 / fan_in ** 0.5)
    # eval-mode BN (running_mean=0, running_var=1, gamma=1, beta=0) folded into conv
    scale = 1.0 / (1.0 + BN_EPS) ** 0.5
    w = w * scale
    cb = cb * scale
    w = jnp.pad(w, ((0, 0), (0, cin_pad - cin), (0, cout_pad - cout)))
    cb = jnp.pad(cb, ((0, cout_pad - cout),))
    return (w.astype(jnp.bfloat16), cb.reshape(1, cout_pad).astype(jnp.float32))


def init_lstm(key, din, hidden, din_pad=None):
    din_pad = din if din_pad is None else din_pad
    k1, k2, k3, k4 = jax.random.split(key, 4)
    s = 1.0 / hidden ** 0.5
    w_ih = jnp.pad(_uniform(k1, (din, 4 * hidden), s), ((0, din_pad - din), (0, 0)))
    w_hh = _uniform(k2, (hidden, 4 * hidden), s)
    b = _uniform(k3, (1, 4 * hidden), s) + _uniform(k4, (1, 4 * hidden), s)  # b_ih+b_hh
    return (w_ih.astype(jnp.bfloat16), w_hh.astype(jnp.bfloat16), b.astype(jnp.float32))


def init_bilstm(key, din, hidden):
    """Bidirectional layer: fused (din, 8H) input weight + block-diag (2H, 8H) recurrent."""
    kf, kb = jax.random.split(key)
    w_ih_f, w_hh_f, b_f = init_lstm(kf, din, hidden)
    w_ih_b, w_hh_b, b_b = init_lstm(kb, din, hidden)
    w_ih = jnp.concatenate([w_ih_f, w_ih_b], axis=1)                   # (din, 8H) bf16
    b = jnp.concatenate([b_f, b_b], axis=1)                            # (1, 8H) f32
    zero = jnp.zeros((hidden, 4 * hidden), jnp.bfloat16)
    w_bd = jnp.concatenate(
        [jnp.concatenate([w_hh_f, zero], axis=1),
         jnp.concatenate([zero, w_hh_b], axis=1)], axis=0)             # (2H, 8H) bf16
    return {"w_ih": w_ih, "b": b, "w_bd": w_bd}


def init_generator_params(key, dim_emb, dim_pre):
    keys = iter(jax.random.split(key, 32))
    n_mel = 80
    encoder = {
        "convs": [
            init_conv_bn(next(keys), n_mel, 512, cin_pad=MEL_PAD),
            init_conv_bn(next(keys), 512, 512),
            init_conv_bn(next(keys), 512, 512),
        ],
        "lstm": [init_bilstm(next(keys), 512, 256),
                 init_bilstm(next(keys), 512, 256)],
    }
    din1 = 256 * 2 + dim_emb + 1
    kpw, kpb = jax.random.split(next(keys))
    proj_w = _uniform(kpw, (1024, n_mel), (6.0 / (1024 + n_mel)) ** 0.5)
    proj_b = _uniform(kpb, (1, n_mel), 1.0 / 1024 ** 0.5)
    decoder = {
        "lstm1": init_lstm(next(keys), din1, dim_pre, din_pad=_round_up(din1)),
        "convs": [init_conv_bn(next(keys), dim_pre, dim_pre) for _ in range(3)],
        "lstm2": [init_lstm(next(keys), dim_pre, 1024), init_lstm(next(keys), 1024, 1024)],
        "proj_w": jnp.pad(proj_w, ((0, 0), (0, MEL_PAD - n_mel))).astype(jnp.bfloat16),
        "proj_b": jnp.pad(proj_b, ((0, 0), (0, MEL_PAD - n_mel))).astype(jnp.float32),
    }
    postnet = {
        "convs": (
            [init_conv_bn(next(keys), n_mel, 512, cin_pad=MEL_PAD)]
            + [init_conv_bn(next(keys), 512, 512) for _ in range(3)]
            + [init_conv_bn(next(keys), 512, n_mel, cout_pad=MEL_PAD)]
        ),
    }
    return {"encoder": encoder, "decoder": decoder, "postnet": postnet}


# ----------------------------- module forwards -----------------------------

def encoder_forward(params, x, freq):
    # x: (B, T, MEL_PAD) bf16  (NLC view of PyTorch (B, 80, T), channels zero-padded)
    h = x
    for (w, b) in params["convs"]:
        h = conv1d_bn_act(h, w, b, act="relu")
    for layer in params["lstm"]:
        h = bilstm_layer(h, layer)                       # (B, T, 512)
    B, T, _ = h.shape
    assert T % freq == 0, "sequence length must be a multiple of freq (as in PyTorch)"
    nc = T // freq
    out_f = h[:, :, :256].reshape(B, nc, freq, 256)[:, :, freq - 1, :]
    out_b = h[:, :, 256:].reshape(B, nc, freq, 256)[:, :, 0, :]
    return jnp.concatenate([out_f, out_b], axis=-1)      # (B, nc, 512) bf16


def decoder_forward(params, x):
    # x: (B, L, din_pad) bf16
    h = lstm_layer(x, *params["lstm1"])
    for (w, b) in params["convs"]:
        h = conv1d_bn_act(h, w, b, act="relu")
    for layer in params["lstm2"]:
        h = lstm_layer(h, *layer)
    B, L, H = h.shape
    out = matmul_bias(h.reshape(B * L, H), params["proj_w"], params["proj_b"],
                      out_dtype=jnp.float32)
    return out.reshape(B, L, MEL_PAD)          # mel channels 80..127 are zero


def postnet_forward(params, x):
    # x: (B, L, MEL_PAD) bf16
    h = x
    for (w, b) in params["convs"][:-1]:
        h = conv1d_bn_act(h, w, b, act="tanh")
    w, b = params["convs"][-1]
    return conv1d_bn_act(h, w, b, act="none", out_dtype=jnp.float32)


def generator_forward(params, x, c_trg, freq):
    # x: (B, T, 80) f32 (NLC view of PyTorch (B, 80, T))   c_trg: (B, dim_emb+1, num_codes) f32
    B, T, n_mel = x.shape
    x_p = jnp.pad(x, ((0, 0), (0, 0), (0, MEL_PAD - n_mel))).astype(jnp.bfloat16)
    codes = encoder_forward(params["encoder"], x_p, freq)               # (B, nc, 512)
    nc = codes.shape[1]
    codes_cat = codes.reshape(B, nc * 512).astype(jnp.float32)
    if c_trg is None:
        return codes_cat
    # encoder_outputs: cat(code_exp, c_trg) along channel, then transpose -> (B, nc, 529)
    enc = jnp.concatenate(
        [codes, jnp.transpose(c_trg, (0, 2, 1)).astype(jnp.bfloat16)], axis=-1)
    din_pad = params["decoder"]["lstm1"][0].shape[0]
    enc = jnp.pad(enc, ((0, 0), (0, 0), (0, din_pad - enc.shape[-1])))
    mel128 = decoder_forward(params["decoder"], enc)                    # (B, nc, 128) f32
    post128 = postnet_forward(params["postnet"], mel128.astype(jnp.bfloat16))
    melp128 = mel128 + post128
    mel = jnp.transpose(mel128[..., :n_mel], (0, 2, 1))                 # (B, 80, nc)
    mel_post = jnp.transpose(melp128[..., :n_mel], (0, 2, 1))           # (B, 80, nc)
    return mel, mel_post, codes_cat


# ----------------------------------- main -----------------------------------

if __name__ == "__main__":
    B, T = 2, 16
    dim_emb, dim_pre, freq = 16, 128, 4
    num_codes = T // freq

    key = jax.random.PRNGKey(0)
    k_x, k_c, k_p = jax.random.split(key, 3)

    # x is the NLC view of the PyTorch input (B, 80, T): here (B, T, 80)
    x = jax.random.normal(k_x, (B, T, 80), jnp.float32)
    # c_trg matches the PyTorch layout (B, dim_emb + 1, num_codes)
    c_trg = jax.random.normal(k_c, (B, dim_emb + 1, num_codes), jnp.float32)

    params = init_generator_params(k_p, dim_emb, dim_pre)

    mel, mel_post, codes_cat = generator_forward(params, x, c_trg, freq)
    jax.block_until_ready((mel, mel_post, codes_cat))

    assert mel.shape == (B, 80, num_codes)
    assert mel_post.shape == (B, 80, num_codes)
    assert codes_cat.shape == (B, 512 * num_codes)
    assert bool(jnp.all(jnp.isfinite(mel))) and bool(jnp.all(jnp.isfinite(mel_post)))

    print("KERNEL_OK")
</pallas_src>

<mosaic_0001>
module attributes {stable_mosaic.version = 11 : i64} {
  func.func @_conv1d_act_kernel(%arg0: i32, %arg1: memref<1x16x128xbf16, #tpu.memory_space<vmem>>, %arg2: memref<5x128x512xbf16, #tpu.memory_space<vmem>>, %arg3: memref<1x512xf32, #tpu.memory_space<vmem>>, %arg4: memref<1x16x512xbf16, #tpu.memory_space<vmem>>) attributes {dimension_semantics = [#tpu.dimension_semantics<parallel>], iteration_bounds = array<i64: 2>, scalar_prefetch = 0 : i64, scratch_operands = 0 : i64, tpu.core_type = #tpu.core_type<tc>, window_params = [{transform_indices = @transform_0, window_bounds = array<i64: 1, 16, 128>}, {pipeline_mode = #tpu.pipeline_mode<synchronous>, transform_indices = @transform_1, window_bounds = array<i64: 5, 128, 512>}, {pipeline_mode = #tpu.pipeline_mode<synchronous>, transform_indices = @transform_2, window_bounds = array<i64: 1, 512>}, {transform_indices = @transform_3, window_bounds = array<i64: 1, 16, 512>}]} {
    %c0 = arith.constant 0 : index
    %c0_0 = arith.constant 0 : index
    %c0_1 = arith.constant 0 : index
    %0 = vector.load %arg1[%c0, %c0_0, %c0_1] : memref<1x16x128xbf16, #tpu.memory_space<vmem>>, vector<1x16x128xbf16>
    %1 = vector.shape_cast %0 : vector<1x16x128xbf16> to vector<16x128xbf16>
    %cst = arith.constant 0.000000e+00 : bf16
    %2 = vector.broadcast %cst : bf16 to vector<2x128xbf16>
    %3 = tpu.concatenate %2, %1, %2 in 0 : vector<2x128xbf16>, vector<16x128xbf16>, vector<2x128xbf16> -> vector<20x128xbf16>
    %cst_2 = arith.constant 0.000000e+00 : f32
    %4 = vector.broadcast %cst_2 : f32 to vector<16x512xf32>
    %5 = vector.extract_strided_slice %3 {offsets = [0, 0], sizes = [16, 128], strides = [1, 1]} : vector<20x128xbf16> to vector<16x128xbf16>
    %c0_3 = arith.constant 0 : index
    %c0_4 = arith.constant 0 : index
    %c0_5 = arith.constant 0 : index
    %6 = vector.load %arg2[%c0_3, %c0_4, %c0_5] : memref<5x128x512xbf16, #tpu.memory_space<vmem>>, vector<1x128x512xbf16>
    %7 = vector.shape_cast %6 : vector<1x128x512xbf16> to vector<128x512xbf16>
    %cst_6 = arith.constant dense<0.000000e+00> : vector<16x512xf32>
    %8 = tpu.matmul %5, %7, %cst_6 {dimension_numbers = #tpu.dot_dimension_numbers<[1], [0], [0], [1], [0, 0, 1, 1], [], []>} : vector<16x128xbf16>, vector<128x512xbf16>, vector<16x512xf32> -> vector<16x512xf32>
    %9 = arith.addf %4, %8 : vector<16x512xf32>
    %10 = vector.extract_strided_slice %3 {offsets = [1, 0], sizes = [16, 128], strides = [1, 1]} : vector<20x128xbf16> to vector<16x128xbf16>
    %c1 = arith.constant 1 : index
    %c0_7 = arith.constant 0 : index
    %c0_8 = arith.constant 0 : index
    %11 = vector.load %arg2[%c1, %c0_7, %c0_8] : memref<5x128x512xbf16, #tpu.memory_space<vmem>>, vector<1x128x512xbf16>
    %12 = vector.shape_cast %11 : vector<1x128x512xbf16> to vector<128x512xbf16>
    %cst_9 = arith.constant dense<0.000000e+00> : vector<16x512xf32>
    %13 = tpu.matmul %10, %12, %cst_9 {dimension_numbers = #tpu.dot_dimension_numbers<[1], [0], [0], [1], [0, 0, 1, 1], [], []>} : vector<16x128xbf16>, vector<128x512xbf16>, vector<16x512xf32> -> vector<16x512xf32>
    %14 = arith.addf %9, %13 : vector<16x512xf32>
    %15 = vector.extract_strided_slice %3 {offsets = [2, 0], sizes = [16, 128], strides = [1, 1]} : vector<20x128xbf16> to vector<16x128xbf16>
    %c2 = arith.constant 2 : index
    %c0_10 = arith.constant 0 : index
    %c0_11 = arith.constant 0 : index
    %16 = vector.load %arg2[%c2, %c0_10, %c0_11] : memref<5x128x512xbf16, #tpu.memory_space<vmem>>, vector<1x128x512xbf16>
    %17 = vector.shape_cast %16 : vector<1x128x512xbf16> to vector<128x512xbf16>
    %cst_12 = arith.constant dense<0.000000e+00> : vector<16x512xf32>
    %18 = tpu.matmul %15, %17, %cst_12 {dimension_numbers = #tpu.dot_dimension_numbers<[1], [0], [0], [1], [0, 0, 1, 1], [], []>} : vector<16x128xbf16>, vector<128x512xbf16>, vector<16x512xf32> -> vector<16x512xf32>
    %19 = arith.addf %14, %18 : vector<16x512xf32>
    %20 = vector.extract_strided_slice %3 {offsets = [3, 0], sizes = [16, 128], strides = [1, 1]} : vector<20x128xbf16> to vector<16x128xbf16>
    %c3 = arith.constant 3 : index
    %c0_13 = arith.constant 0 : index
    %c0_14 = arith.constant 0 : index
    %21 = vector.load %arg2[%c3, %c0_13, %c0_14] : memref<5x128x512xbf16, #tpu.memory_space<vmem>>, vector<1x128x512xbf16>
    %22 = vector.shape_cast %21 : vector<1x128x512xbf16> to vector<128x512xbf16>
    %cst_15 = arith.constant dense<0.000000e+00> : vector<16x512xf32>
    %23 = tpu.matmul %20, %22, %cst_15 {dimension_numbers = #tpu.dot_dimension_numbers<[1], [0], [0], [1], [0, 0, 1, 1], [], []>} : vector<16x128xbf16>, vector<128x512xbf16>, vector<16x512xf32> -> vector<16x512xf32>
    %24 = arith.addf %19, %23 : vector<16x512xf32>
    %25 = vector.extract_strided_slice %3 {offsets = [4, 0], sizes = [16, 128], strides = [1, 1]} : vector<20x128xbf16> to vector<16x128xbf16>
    %c4 = arith.constant 4 : index
    %c0_16 = arith.constant 0 : index
    %c0_17 = arith.constant 0 : index
    %26 = vector.load %arg2[%c4, %c0_16, %c0_17] : memref<5x128x512xbf16, #tpu.memory_space<vmem>>, vector<1x128x512xbf16>
    %27 = vector.shape_cast %26 : vector<1x128x512xbf16> to vector<128x512xbf16>
    %cst_18 = arith.constant dense<0.000000e+00> : vector<16x512xf32>
    %28 = tpu.matmul %25, %27, %cst_18 {dimension_numbers = #tpu.dot_dimension_numbers<[1], [0], [0], [1], [0, 0, 1, 1], [], []>} : vector<16x128xbf16>, vector<128x512xbf16>, vector<16x512xf32> -> vector<16x512xf32>
    %29 = arith.addf %24, %28 : vector<16x512xf32>
    %c0_19 = arith.constant 0 : index
    %c0_20 = arith.constant 0 : index
    %30 = vector.load %arg3[%c0_19, %c0_20] : memref<1x512xf32, #tpu.memory_space<vmem>>, vector<1x512xf32>
    %31 = vector.broadcast %30 : vector<1x512xf32> to vector<16x512xf32>
    %32 = arith.addf %29, %31 : vector<16x512xf32>
    %cst_21 = arith.constant 0.000000e+00 : f32
    %33 = vector.broadcast %cst_21 : f32 to vector<16x512xf32>
    %34 = arith.maximumf %32, %33 : vector<16x512xf32>
    %35 = arith.truncf %34 : vector<16x512xf32> to vector<16x512xbf16>
    %c0_22 = arith.constant 0 : index
    %c0_23 = arith.constant 0 : index
    %c0_24 = arith.constant 0 : index
    %36 = vector.load %arg4[%c0_22, %c0_23, %c0_24] : memref<1x16x512xbf16, #tpu.memory_space<vmem>>, vector<1x16x512xbf16>
    %37 = vector.shape_cast %36 : vector<1x16x512xbf16> to vector<16x512xbf16>
    %38 = vector.shape_cast %35 : vector<16x512xbf16> to vector<1x16x512xbf16>
    tpu.vector_store %arg4[%c0_22, %c0_23, %c0_24], %38 {strides = array<i32>} : memref<1x16x512xbf16, #tpu.memory_space<vmem>>, vector<1x16x512xbf16>,
    return
  }
  func.func @transform_0(%arg0: i32) -> (i32, i32, i32) {
    %c0_i32 = arith.constant 0 : i32
    %c0_i32_0 = arith.constant 0 : i32
    %c0_i32_1 = arith.constant 0 : i32
    return %arg0, %c0_i32, %c0_i32_0 : i32, i32, i32
  }
  func.func @transform_1(%arg0: i32) -> (i32, i32, i32) {
    %c0_i32 = arith.constant 0 : i32
    %c0_i32_0 = arith.constant 0 : i32
    %c0_i32_1 = arith.constant 0 : i32
    %c0_i32_2 = arith.constant 0 : i32
    return %c0_i32, %c0_i32_0, %c0_i32_1 : i32, i32, i32
  }
  func.func @transform_2(%arg0: i32) -> (i32, i32) {
    %c0_i32 = arith.constant 0 : i32
    %c0_i32_0 = arith.constant 0 : i32
    %c0_i32_1 = arith.constant 0 : i32
    return %c0_i32, %c0_i32_0 : i32, i32
  }
  func.func @transform_3(%arg0: i32) -> (i32, i32, i32) {
    %c0_i32 = arith.constant 0 : i32
    %c0_i32_0 = arith.constant 0 : i32
    %c0_i32_1 = arith.constant 0 : i32
    return %arg0, %c0_i32, %c0_i32_0 : i32, i32, i32
  }
}

</mosaic_0001>

<bundles_post_ra>
// kernel: tpu_custom_call.1
= control target key start
LH: loop header
LB: loop body
LE: loop exit
PB: predicated region body
PF: predicated region fallthrough
CT: control target
= control target key end

     0   :  { %8 = vsyncpa [#allocation3], 0  ;;  %s2763_s0 = inlined_call_operand.hbm [shape: bf16[2,16,128], index: 0, kind: input, shape index: {}]   ;;  %s2764_s1 = inlined_call_operand.hbm [shape: bf16[5,128,512], index: 1, kind: input, shape index: {}]   ;;  %s2765_s2 = inlined_call_operand.vmem [shape: f32[1,512], index: 2, kind: input, shape index: {}]   ;;  %s2766_s3 = inlined_call_operand.hbm [shape: bf16[2,16,512], index: 3, kind: output, shape index: {}]  }
   0x1   :  { %10 = vsyncpa [#allocation3 + $0x1], 0 }
   0x2   :  { %11 = vsyncpa [#allocation6], 0 }
   0x3   :  { %12 = vsyncpa [#allocation4], 0 }
   0x4   :  { %14 = vsyncpa [#allocation4 + $0x1], 0  ;;  %s2523_s12 = smov 0   ;;  %s2525_s13 = smov 0  }
   0x5   :  { %s2527_s14 = smov 0   ;;  %s2529_s15 = smov 0  }
   0x6 LB: > { %s2544_s16 = sadd.s32 4294967295, %s2491_s15   ;;  %s1835_s17 = sadd.s32 4294967294, %s2491_s15   ;;  %s2491_s15 = sphi %s2529_s15, %s2786_s15   ;;  %s2487_s14 = sphi %s2527_s14, %s2785_s14   ;;  %s2483_s13 = sphi %s2525_s13, %s2784_s13   ;;  %s2479_s12 = sphi %s2523_s12, %s2783_s12  }
   0x7   : > { %p40_p0 = scmp.ne.s32.totalorder %s2483_s13, %s2479_s12  ;;  %p2767_p1 = scmp.eq.s32.totalorder %s2544_s16, 0 }
   0x8   : > { %p112_p3 = scmp.eq.s32.totalorder %s1835_s17, 1  ;;  %p1836_p5 = scmp.ge.s32.totalorder %s2491_s15, 1 }
   0x9   : > { %p2553_p4 = por %p2767_p1, %p40_p0  ;;  %p119_p7 = scmp.lt.s32.totalorder %s2491_s15, 3 }
   0xa   : > { %p2558_p6 = por %p112_p3, %p40_p0  ;;  %s2493_s21 = smov [#allocation5]  }
   0xb   : > { %s2770_s18 = scalar_select %p2553_p4, 1, 0 }
   0xc   : > { %s2771_s19 = scalar_select %p2558_p6, 1, 0 }
   0xd   : > { %p2563_p8 = pnand %p1836_p5, %p119_p7  ;;  %s131_s22 = sshll.u32 %s2493_s21, 4  ;;  %s2567_s22 = int_to_ptr.vmem [resolvable:$true] %s131_s22 }
   0xe   : > { %s2579_s24 = sadd.s32 1, %s2491_s15   ;;  %s27_s25 = sadd.s32 1, %s2487_s14 }
   0xf   : > { %s2772_s20 = scalar_select %p2563_p8, 1, 0 }
  0x10   : > { %p2066_p9 = pneg %p2563_p8  ;;  %s24_s26 = ssub.s32 %s2491_s15, %s2579_s24 }
  0x11   : > { %s2363_s29 = scalar_lea.hbm %s2764_s1, 20480 }
  0x12   : > { %p2574_p11 = pnand %p2066_p9, %p2767_p1  ;;  %p2364_p12 = scmp.ne.s32.totalorder %s2764_s1, %s2363_s29 }
  0x13   : > { %p2370_p5 = scmp.lt.u32.totalorder %s2363_s29, %s2764_s1 }
  0x14   : > { %p2365_p13 = pneg %p2574_p11 }
  0x16   : > { %p2366_p0 = pnand %p2365_p13, %p2364_p12 }
  0x18   : > { %p2367_p3 = pneg %p2366_p0 }
  0x1a   : > { %p2372_p7 = pnand %p2370_p5, %p2367_p3 }
  0x1c   : > { %2375 = shalt.err (!%p2372_p7)
}
  0x1d   : > { %s2376_s7 = scalar_lea.vmem %s2567_s22, 20480  ;;  %p2384_p2 = scmp.lt.s32.totalorder %s2567_s22, %s2567_s22 }
  0x1e   : > { %p2377_p9 = scmp.ne.s32.totalorder %s2567_s22, %s2376_s7  ;;  %p2385_p6 = scmp.lt.s32.totalorder %s2376_s7, %s2376_s7 }
  0x20   : > { %p2379_p10 = pnand %p2377_p9, %p2365_p13  ;;  %p2386_p4 = por %p2385_p6, %p2384_p2 }
  0x22   : > { %p2380_p1 = pneg %p2379_p10 }
  0x24   : > { %p2387_p8 = pnand %p2386_p4, %p2380_p1 }
  0x26   : > { %2390 = shalt.err (!%p2387_p8)
}
  0x27   : > { %s2494_s8 = smov 256   ;;  %s2495_s9 = smov 16  }
  0x28   : > { %2069 = dma.hbm_to_vmem [thread:$0]  (!%p2574_p11), %s2764_s1, 20480, %s2567_s22, [#allocation6], %s2494_s8, %s2494_s8, %s2495_s9  }
  0x29   : > { %p25_p2 = scmp.eq.s32.totalorder %s24_s26, 0  ;;  %p34_p1 = scmp.ne.s32.totalorder %s2487_s14, %s2483_s13 }
  0x2a   : > { %p35_p4 = scmp.eq.s32.totalorder %s2491_s15, 0  ;;  %p2079_p6 = scmp.lt.s32.totalorder %s2491_s15, 2 }
  0x2b   : > { %s2610_s17 = scalar_select %p25_p2, %s2487_s14, %s27_s25  }
  0x2c   : > { %p36_p8 = por %p35_p4, %p34_p1  ;;  %p2774_p10 = scmp.eq.s32.totalorder %s2544_s16, 1 }
  0x2d   : > { %s148_s27 = sand.u32 1, %s2487_s14   ;;  %s2020_s28 = sshll.u32 %s2491_s15, 7 }
  0x2e   : > { %p2614_p12 = por %p2774_p10, %p34_p1  ;;  %s1839_s29 = sshll.u32 %s148_s27, 3 }
  0x2f   : > { %s2623_s4 = scalar_lea.hbm %s2763_s0, %s2020_s28  ;;  %s152_s22 = scalar_lea.vmem [#allocation2], %s1839_s29 }
  0x30   : > { %s159_s25 = sshll.u32 %s152_s22, 4  ;;  %p2625_p11 = pnand %p2079_p6, %p36_p8  ;;  %s2629_s25 = int_to_ptr.vmem [resolvable:$true] %s159_s25 }
  0x31   : > { %s2631_s5 = scalar_lea.sflag [#allocation3], %s148_s27  ;;  %s2391_s6 = scalar_lea.hbm %s2623_s4, 128 }
  0x32   : > { %p2392_p13 = scmp.ne.s32.totalorder %s2623_s4, %s2391_s6  ;;  %p2393_p0 = pneg %p2625_p11 }
  0x33   : > { %s2396_s9 = scalar_lea.hbm %s2763_s0, 256  ;;  %p2397_p7 = scmp.lt.u32.totalorder %s2623_s4, %s2763_s0 }
  0x34   : > { %p2394_p3 = pnand %p2393_p0, %p2392_p13  ;;  %p2398_p9 = scmp.lt.u32.totalorder %s2396_s9, %s2391_s6 }
  0x35   : > { %p2400_p1 = scmp.lt.u32.totalorder %s2391_s6, %s2623_s4 }
  0x36   : > { %p2395_p5 = pneg %p2394_p3  ;;  %p2399_p2 = por %p2398_p9, %p2397_p7 }
  0x38   : > { %p2401_p4 = por %p2400_p1, %p2399_p2 }
  0x3a   : > { %p2402_p6 = pnand %p2401_p4, %p2395_p5 }
  0x3c   : > { %2405 = shalt.err (!%p2402_p6)
}
  0x3d   : > { %s2406_s27 = scalar_lea.vmem %s2629_s25, 128  ;;  %s2496_s28 = smov [#allocation2]  }
  0x3e   : > { %p2407_p8 = scmp.ne.s32.totalorder %s2629_s25, %s2406_s27  ;;  %s2411_s29 = sshll.u32 %s2496_s28, 4  ;;  %s2412_s29 = int_to_ptr.vmem [resolvable:$false] %s2411_s29 }
  0x3f   : > { %s2413_s23 = scalar_lea.vmem %s2412_s29, 256  ;;  %p2414_p3 = scmp.lt.s32.totalorder %s2629_s25, %s2412_s29 }
  0x40   : > { %p2409_p10 = pnand %p2407_p8, %p2393_p0  ;;  %p2415_p7 = scmp.lt.s32.totalorder %s2413_s23, %s2406_s27 }
  0x42   : > { %p2410_p13 = pneg %p2409_p10  ;;  %p2416_p9 = por %p2415_p7, %p2414_p3 }
  0x44   : > { %p2417_p2 = pnand %p2416_p9, %p2410_p13 }
  0x46   : > { %2420 = shalt.err (!%p2417_p2)
}
  0x47   : > { %s2497_s30 = smov 64   ;;  %s2498_s22 = smov 4  }
  0x48   : > { %2073 = dma.hbm_to_vmem [thread:$0]  (!%p2625_p11), %s2623_s4, 128, %s2629_s25, %s2631_s5, %s2497_s30, %s2497_s30, %s2498_s22  }
  0x49   : > { %p2777_p0 = scmp.ne.s32.totalorder %s2772_s20, 0 }
  0x4a   : > { %s2662_s6 = sand.u32 (!%p2777_p0), 1, %s2483_s13   ;;  %p2778_p5 = scmp.ne.s32.totalorder (!%p2777_p0), %s2770_s18, 0 }
  0x4b   : > { %171 = sbr.rel (%p2777_p0) target bundleno = 484 (0x1e4), region = 32  ;;  %s1843_s7 = sshll.u32 (!%p2777_p0), %s2662_s6, 3 }
  0x4c   : > { %s174_s8 = scalar_lea.sflag (!%p2777_p0), [#allocation3], %s2662_s6  ;;  %s2666_s9 = scalar_lea.vmem (!%p2777_p0), [#allocation2], %s1843_s7 }
  0x52   : > { %2466 = dma.done.wait (%p2778_p5), %s174_s8, 128  }
  0x53   : > { %2468 = vsyncadd (%p2778_p5), %s174_s8, 4294967168  ;;  %p2779_p11 = scmp.eq.s32.totalorder %s2544_s16, 0 }
  0x55   : > { %2470 = dma.done.wait (%p2779_p11), [#allocation6], 20480   ;;  %p2780_p1 = pmov %p2779_p11 }
  0x56   : > { %v2499_v0 = vmov 0   ;;  %v2122_v1 = vld [vmem:[#allocation5 + $0x104] ss:$16 sps:$4 sm:$0xff]   ;;  %v2124_v2 = vld [vmem:[#allocation5 + $0x10c] ss:$16 sps:$4 sm:$0xff]   ;;  %vm213_vm0 = vcmask 1040384  }
  0x57   : > { %2472 = vsyncadd (%p2780_p1), [#allocation6], 4294946816  ;;  %488 = vmatprep.mubr.bf16.mxu0 %v2499_v0  ;;  %531 = vmatprep.mubr.bf16.mxu1 %v2499_v0  ;;  %v2126_v3 = vld [vmem:[#allocation5 + $0x100] ss:$16 sps:$4 sm:$0xff]   ;;  %v2127_v4 = vld [vmem:[#allocation5 + $0x108] ss:$16 sps:$4 sm:$0xff]  }
  0x58   : > { %456 = vmatprep.subr.bf16.mxu0 %v2122_v1  ;;  %499 = vmatprep.subr.bf16.mxu1 %v2124_v2  ;;  %v2128_v5 = vld [vmem:[#allocation5 + $0x124] ss:$16 sps:$4 sm:$0xff]   ;;  %v2130_v6 = vld [vmem:[#allocation5 + $0x12c] ss:$16 sps:$4 sm:$0xff]   ;;  %v2132_v7 = vld [vmem:[#allocation5 + $0x120] ss:$16 sps:$4 sm:$0xff]  }
  0x59   : > { %457 = vmatpush1.bf16.msra.mxu0 %v2126_v3  ;;  %500 = vmatpush1.bf16.msra.mxu1 %v2127_v4  ;;  %v2133_v8 = vld [vmem:[#allocation5 + $0x128] ss:$16 sps:$4 sm:$0xff]   ;;  %v2134_v9 = vld [vmem:[#allocation5 + $0x144] ss:$16 sps:$4 sm:$0xff]   ;;  %v2136_v10 = vld [vmem:[#allocation5 + $0x14c] ss:$16 sps:$4 sm:$0xff]  }
  0x5a   : > { %458 = vmatprep.subr.bf16.mxu0 %v2128_v5  ;;  %501 = vmatprep.subr.bf16.mxu1 %v2130_v6  ;;  %v2138_v11 = vld [vmem:[#allocation5 + $0x140] ss:$16 sps:$4 sm:$0xff]   ;;  %v2139_v12 = vld [vmem:[#allocation5 + $0x148] ss:$16 sps:$4 sm:$0xff]   ;;  %v2140_v13 = vld [vmem:[#allocation5 + $0x164] ss:$16 sps:$4 sm:$0xff]  }
  0x5b   : > { %v2142_v14 = vld [vmem:[#allocation5 + $0x16c] ss:$16 sps:$4 sm:$0xff]   ;;  %v2144_v15 = vld [vmem:[#allocation5 + $0x160] ss:$16 sps:$4 sm:$0xff]   ;;  %v2145_v16 = vld [vmem:[#allocation5 + $0x168] ss:$16 sps:$4 sm:$0xff]  }
  0x5c   : > { %v2146_v17 = vld [vmem:[#allocation5 + $0x184] ss:$16 sps:$4 sm:$0xff]   ;;  %v2148_v18 = vld [vmem:[#allocation5 + $0x18c] ss:$16 sps:$4 sm:$0xff]   ;;  %v2150_v19 = vld [vmem:[#allocation5 + $0x180] ss:$16 sps:$4 sm:$0xff]  }
  0x5d   : > { %459 = vmatpush1.bf16.msra.mxu0 %v2132_v7  ;;  %502 = vmatpush1.bf16.msra.mxu1 %v2133_v8  ;;  %v2151_v20 = vld [vmem:[#allocation5 + $0x188] ss:$16 sps:$4 sm:$0xff]   ;;  %v2152_v21 = vld [vmem:[#allocation5 + $0x1a4] ss:$16 sps:$4 sm:$0xff]   ;;  %v2154_v22 = vld [vmem:[#allocation5 + $0x1ac] ss:$16 sps:$4 sm:$0xff]  }
  0x5e   : > { %460 = vmatprep.subr.bf16.mxu0 %v2134_v9  ;;  %503 = vmatprep.subr.bf16.mxu1 %v2136_v10  ;;  %v2156_v23 = vld [vmem:[#allocation5 + $0x1a0] ss:$16 sps:$4 sm:$0xff]   ;;  %v2157_v24 = vld [vmem:[#allocation5 + $0x1a8] ss:$16 sps:$4 sm:$0xff]   ;;  %v2158_v25 = vld [vmem:[#allocation5 + $0x1c4] ss:$16 sps:$4 sm:$0xff]  }
  0x5f   : > { %v2160_v26 = vld [vmem:[#allocation5 + $0x1cc] ss:$16 sps:$4 sm:$0xff]   ;;  %v2162_v27 = vld [vmem:[#allocation5 + $0x1c0] ss:$16 sps:$4 sm:$0xff]   ;;  %v2163_v28 = vld [vmem:[#allocation5 + $0x1c8] ss:$16 sps:$4 sm:$0xff]  }
  0x60   : > { %v2164_v29 = vld [vmem:[#allocation5 + $0x1e4] ss:$16 sps:$4 sm:$0xff]   ;;  %v2166_v31 = vld [vmem:[#allocation5 + $0x1ec] ss:$16 sps:$4 sm:$0xff]   ;;  %v2168_v33 = vld [vmem:[#allocation5 + $0x1e0] ss:$16 sps:$4 sm:$0xff]  }
  0x61   : > { %461 = vmatpush1.bf16.msra.mxu0 %v2138_v11  ;;  %504 = vmatpush1.bf16.msra.mxu1 %v2139_v12  ;;  %v2176_v30 = vld [vmem:[%s2666_s9] sm:$0xff]   ;;  %vm823_vm1 = vcmask 1046528   ;;  %vm284_vm2 = vsmask.f32 7424  ;;  %vm1115_vm3 = vsmask.f32 6400  ;;  %vm1911_vm5 = vmneg %vm213_vm0 }
  0x62   : > { %462 = vmatprep.subr.bf16.mxu0 %v2140_v13  ;;  %505 = vmatprep.subr.bf16.mxu1 %v2142_v14  ;;  %v2679_v32 = vrot.slane %v2176_v30, 7  ;;  %v2169_v34 = vld [vmem:[#allocation5 + $0x1e8] ss:$16 sps:$4 sm:$0xff]   ;;  %v2172_v35 = vld [vmem:[#allocation5 + $0x4] ss:$16 sps:$4 sm:$0xff]   ;;  %vm1413_vm4 = vcmask 1045504  }
  0x63   : > { %v2175_v38 = vld [vmem:[#allocation5 + $0xc] ss:$16 sps:$4 sm:$0xff]   ;;  %v2170_v45 = vld [vmem:[#allocation5] ss:$16 sps:$4 sm:$0xff]   ;;  %v2173_v47 = vld [vmem:[#allocation5 + $0x8] ss:$16 sps:$4 sm:$0xff]  }
  0x64   : > { %v216_v36 = vsel %vm213_vm0, 0, %v2679_v32  ;;  %v218_v37 = vsel %vm213_vm0, %v2679_v32, 0  ;;  %v2179_v51 = vld [vmem:[#allocation5 + $0x24] ss:$16 sps:$4 sm:$0xff]   ;;  %v2182_v52 = vld [vmem:[#allocation5 + $0x2c] ss:$16 sps:$4 sm:$0xff]  }
  0x65   : > { %463 = vmatpush1.bf16.msra.mxu0 %v2144_v15  ;;  %506 = vmatpush1.bf16.msra.mxu1 %v2145_v16  ;;  %v285_v39 = vshrl.u32 %v216_v36, 16  ;;  %v287_v40 = vshll.u32 %v216_v36, 16  ;;  %v291_v41 = vshll.u32 %v218_v37, 16  ;;  %v824_v42 = vrot.slane %v216_v36, 1  ;;  %v2177_v58 = vld [vmem:[#allocation5 + $0x20] ss:$16 sps:$4 sm:$0xff]  }
  0x66   : > { %464 = vmatprep.subr.bf16.mxu0 %v2146_v17  ;;  %507 = vmatprep.subr.bf16.mxu1 %v2148_v18  ;;  %v825_v46 = vrot.slane %v218_v37, 1  ;;  %v1119_v54 = vshrl.u32 %v218_v37, 16  ;;  %v2180_v60 = vld [vmem:[#allocation5 + $0x28] ss:$16 sps:$4 sm:$0xff]   ;;  %v1414_v61 = vrot.slane %v216_v36, 2  ;;  %v1415_v62 = vrot.slane %v218_v37, 2 }
  0x67   : > { %v289_v43 = vrot.slane %v287_v40, 1  ;;  %v293_v44 = vrot.slane %v291_v41, 1  ;;  %v1116_v49 = vrot.slane %v285_v39, 1  ;;  %v1117_v50 = vrot.slane %v287_v40, 2  ;;  %v2185_v63 = vld [vmem:[#allocation5 + $0x44] ss:$16 sps:$4 sm:$0xff]  }
  0x68   : > { %v2685_v53 = vsel %vm823_vm1, %v824_v42, %v825_v46  ;;  %v1122_v57 = vrot.slane %v291_v41, 2  ;;  %v1121_v59 = vrot.slane %v1119_v54, 1  ;;  %v2188_v1 = vld [vmem:[#allocation5 + $0x4c] ss:$16 sps:$4 sm:$0xff]   ;;  %v2689_v3 = vsel %vm1413_vm4, %v1414_v61, %v1415_v62  ;;  %v2183_v4 = vld [vmem:[#allocation5 + $0x40] ss:$16 sps:$4 sm:$0xff]  }
  0x69   : > { %465 = vmatpush1.bf16.msra.mxu0 %v2150_v19  ;;  %508 = vmatpush1.bf16.msra.mxu1 %v2151_v20  ;;  %v290_v48 = vor.u32 %v289_v43, %v285_v39  ;;  %v1118_v56 = vor.u32 %v1117_v50, %v1116_v49  ;;  %v2186_v6 = vld [vmem:[#allocation5 + $0x48] ss:$16 sps:$4 sm:$0xff]   ;;  %v2191_v7 = vld [vmem:[#allocation5 + $0x64] ss:$16 sps:$4 sm:$0xff]   ;;  %v2194_v8 = vld [vmem:[#allocation5 + $0x6c] ss:$16 sps:$4 sm:$0xff]  }
  0x6a   : > { %466 = vmatprep.subr.bf16.mxu0 %v2152_v21  ;;  %509 = vmatprep.subr.bf16.mxu1 %v2154_v22  ;;  %v1123_v2 = vor.u32 %v1122_v57, %v1121_v59  ;;  %v2189_v9 = vld [vmem:[#allocation5 + $0x60] ss:$16 sps:$4 sm:$0xff]   ;;  %v2192_v10 = vld [vmem:[#allocation5 + $0x68] ss:$16 sps:$4 sm:$0xff]   ;;  %v2197_v11 = vld [vmem:[#allocation5 + $0x84] ss:$16 sps:$4 sm:$0xff]  }
  0x6b   : > { %v294_v55 = vsel %vm284_vm2, %v290_v48, %v293_v44  ;;  %v2200_v12 = vld [vmem:[#allocation5 + $0x8c] ss:$16 sps:$4 sm:$0xff]   ;;  %v2195_v13 = vld [vmem:[#allocation5 + $0x80] ss:$16 sps:$4 sm:$0xff]   ;;  %v2198_v14 = vld [vmem:[#allocation5 + $0x88] ss:$16 sps:$4 sm:$0xff]  }
  0x6c   : > { %v2692_v5 = vsel %vm1115_vm3, %v1118_v56, %v1123_v2  ;;  %v2203_v15 = vld [vmem:[#allocation5 + $0xa4] ss:$16 sps:$4 sm:$0xff]   ;;  %v2206_v16 = vld [vmem:[#allocation5 + $0xac] ss:$16 sps:$4 sm:$0xff]   ;;  %v2201_v17 = vld [vmem:[#allocation5 + $0xa0] ss:$16 sps:$4 sm:$0xff]  }
  0x6d   : > { %467 = vmatpush1.bf16.msra.mxu0 %v2156_v23  ;;  %510 = vmatpush1.bf16.msra.mxu1 %v2157_v24  ;;  %v2204_v18 = vld [vmem:[#allocation5 + $0xa8] ss:$16 sps:$4 sm:$0xff]   ;;  %v2209_v19 = vld [vmem:[#allocation5 + $0xc4] ss:$16 sps:$4 sm:$0xff]   ;;  %v2212_v20 = vld [vmem:[#allocation5 + $0xcc] ss:$16 sps:$4 sm:$0xff]  }
  0x6e   : > { %468 = vmatprep.subr.bf16.mxu0 %v2158_v25  ;;  %511 = vmatprep.subr.bf16.mxu1 %v2160_v26  ;;  %v2207_v21 = vld [vmem:[#allocation5 + $0xc0] ss:$16 sps:$4 sm:$0xff]   ;;  %v2210_v22 = vld [vmem:[#allocation5 + $0xc8] ss:$16 sps:$4 sm:$0xff]   ;;  %v2215_v23 = vld [vmem:[#allocation5 + $0xe4] ss:$16 sps:$4 sm:$0xff]  }
  0x6f   : > { %v2218_v24 = vld [vmem:[#allocation5 + $0xec] ss:$16 sps:$4 sm:$0xff]   ;;  %v2213_v25 = vld [vmem:[#allocation5 + $0xe0] ss:$16 sps:$4 sm:$0xff]   ;;  %v2216_v26 = vld [vmem:[#allocation5 + $0xe8] ss:$16 sps:$4 sm:$0xff]  }
  0x70   : > { %v2222_v30 = vld [vmem:[#allocation5 + $0x208] ss:$16 sps:$4 sm:$0xff]   ;;  %v2233_v36 = vld [vmem:[#allocation5 + $0x244] ss:$16 sps:$4 sm:$0xff]   ;;  %v2236_v37 = vld [vmem:[#allocation5 + $0x24c] ss:$16 sps:$4 sm:$0xff]  }
  0x71   : > { %469 = vmatpush1.bf16.msra.mxu0 %v2162_v27  ;;  %512 = vmatpush1.bf16.msra.mxu1 %v2163_v28  ;;  %v2221_v27 = vld [vmem:[#allocation5 + $0x204] ss:$16 sps:$4 sm:$0xff]   ;;  %v2224_v28 = vld [vmem:[#allocation5 + $0x20c] ss:$16 sps:$4 sm:$0xff]   ;;  %v2234_v39 = vld [vmem:[#allocation5 + $0x248] ss:$16 sps:$4 sm:$0xff]  }
  0x72   : > { %470 = vmatprep.subr.bf16.mxu0 %v2164_v29  ;;  %513 = vmatprep.subr.bf16.mxu1 %v2166_v31  ;;  %v2219_v29 = vld [vmem:[#allocation5 + $0x200] ss:$16 sps:$4 sm:$0xff]   ;;  %v2227_v31 = vld [vmem:[#allocation5 + $0x224] ss:$16 sps:$4 sm:$0xff]   ;;  %v2240_v42 = vld [vmem:[#allocation5 + $0x268] ss:$16 sps:$4 sm:$0xff]  }
  0x73   : > { %v2239_v40 = vld [vmem:[#allocation5 + $0x264] ss:$16 sps:$4 sm:$0xff]   ;;  %v2237_v41 = vld [vmem:[#allocation5 + $0x260] ss:$16 sps:$4 sm:$0xff]   ;;  %v2248_v44 = vld [vmem:[#allocation5 + $0x28c] ss:$16 sps:$4 sm:$0xff]  }
  0x74   : > { %v2245_v43 = vld [vmem:[#allocation5 + $0x284] ss:$16 sps:$4 sm:$0xff]   ;;  %v2246_v46 = vld [vmem:[#allocation5 + $0x288] ss:$16 sps:$4 sm:$0xff]   ;;  %v2254_v48 = vld [vmem:[#allocation5 + $0x2ac] ss:$16 sps:$4 sm:$0xff]  }
  0x75   : > { %471 = vmatpush1.bf16.msra.mxu0 %v2168_v33  ;;  %514 = vmatpush1.bf16.msra.mxu1 %v2169_v34  ;;  %v2230_v33 = vld [vmem:[#allocation5 + $0x22c] ss:$16 sps:$4 sm:$0xff]   ;;  %v2225_v34 = vld [vmem:[#allocation5 + $0x220] ss:$16 sps:$4 sm:$0xff]   ;;  %v2252_v50 = vld [vmem:[#allocation5 + $0x2a8] ss:$16 sps:$4 sm:$0xff]  }
  0x76   : > { %702 = vmatprep.subr.bf16.mxu0 %v2172_v35  ;;  %745 = vmatprep.subr.bf16.mxu1 %v2175_v38  ;;  %v2228_v35 = vld [vmem:[#allocation5 + $0x228] ss:$16 sps:$4 sm:$0xff]   ;;  %v2231_v38 = vld [vmem:[#allocation5 + $0x240] ss:$16 sps:$4 sm:$0xff]   ;;  %v2263_v56 = vld [vmem:[#allocation5 + $0x2e4] ss:$16 sps:$4 sm:$0xff]  }
  0x77   : > { %v2249_v49 = vld [vmem:[#allocation5 + $0x2a0] ss:$16 sps:$4 sm:$0xff]   ;;  %v2266_v57 = vld [vmem:[#allocation5 + $0x2ec] ss:$16 sps:$4 sm:$0xff]   ;;  %v2264_v59 = vld [vmem:[#allocation5 + $0x2e8] ss:$16 sps:$4 sm:$0xff]  }
  0x78   : > { %489 = vmatmul.mubr.bf16.vlgmr.msra.gmra.mrb[0].mxu0 %v294_v55  ;;  %532 = vmatmul.mubr.bf16.vlgmr.msra.gmra.mrb[0].mxu1 %v294_v55  ;;  %v2255_v54 = vld [vmem:[#allocation5 + $0x2c0] ss:$16 sps:$4 sm:$0xff]   ;;  %v2258_v55 = vld [vmem:[#allocation5 + $0x2c8] ss:$16 sps:$4 sm:$0xff]   ;;  %v2272_v61 = vld [vmem:[#allocation5 + $0x30c] ss:$16 sps:$4 sm:$0xff]  }
  0x79   : > { %703 = vmatpush1.bf16.msra.mxu0 %v2170_v45  ;;  %746 = vmatpush1.bf16.msra.mxu1 %v2173_v47  ;;  %v2243_v45 = vld [vmem:[#allocation5 + $0x280] ss:$16 sps:$4 sm:$0xff]   ;;  %v2251_v47 = vld [vmem:[#allocation5 + $0x2a4] ss:$16 sps:$4 sm:$0xff]   ;;  %v2278_v2 = vld [vmem:[#allocation5 + $0x32c] ss:$16 sps:$4 sm:$0xff]  }
  0x7a   : > { %704 = vmatprep.subr.bf16.mxu0 %v2179_v51  ;;  %747 = vmatprep.subr.bf16.mxu1 %v2182_v52  ;;  %v2257_v51 = vld [vmem:[#allocation5 + $0x2c4] ss:$16 sps:$4 sm:$0xff]   ;;  %v2260_v52 = vld [vmem:[#allocation5 + $0x2cc] ss:$16 sps:$4 sm:$0xff]   ;;  %v2267_v62 = vld [vmem:[#allocation5 + $0x300] ss:$16 sps:$4 sm:$0xff]  }
  0x7b   : > { %734 = vmatprep.mubr.bf16.mxu0 %v2499_v0  ;;  %777 = vmatprep.mubr.bf16.mxu1 %v2499_v0  ;;  %s1845_s4 = sshll.u32 %s2662_s6, 5  ;;  %s2025_s5 = sshll.u32 %s2544_s16, 9 }
  0x7c   : > { %s203_s25 = scalar_lea.vmem [#allocation7], %s1845_s4  ;;  %s2719_s27 = scalar_lea.hbm %s2766_s3, %s2025_s5 }
  0x7d   : > { %705 = vmatpush1.bf16.msra.mxu0 %v2177_v58  ;;  %748 = vmatpush1.bf16.msra.mxu1 %v2180_v60  ;;  %v2261_v58 = vld [vmem:[#allocation5 + $0x2e0] ss:$16 sps:$4 sm:$0xff]   ;;  %v2269_v60 = vld [vmem:[#allocation5 + $0x304] ss:$16 sps:$4 sm:$0xff]   ;;  %s1752_s26 = sshll.u32 %s203_s25, 4  ;;  %s1739_s16 = scalar_lea.sflag [#allocation4], %s2662_s6  ;;  %s2714_s26 = int_to_ptr.vmem [resolvable:$true] %s1752_s26 }
  0x7e   : > { %706 = vmatprep.subr.bf16.mxu0 %v2185_v63  ;;  %749 = vmatprep.subr.bf16.mxu1 %v2188_v1  ;;  %v2270_v63 = vld [vmem:[#allocation5 + $0x308] ss:$16 sps:$4 sm:$0xff]   ;;  %v2275_v1 = vld [vmem:[#allocation5 + $0x324] ss:$16 sps:$4 sm:$0xff]   ;;  %s2421_s28 = scalar_lea.vmem %s2714_s26, 512  ;;  %s2500_s29 = smov [#allocation7]  }
  0x7f   : > { %p2422_p4 = scmp.ne.s32.totalorder %s2714_s26, %s2421_s28  ;;  %s2425_s23 = sshll.u32 %s2500_s29, 4  ;;  %s2426_s23 = int_to_ptr.vmem [resolvable:$false] %s2425_s23 }
  0x80   : > { %s2427_s30 = scalar_lea.vmem %s2426_s23, 1024  ;;  %p2428_p10 = scmp.lt.s32.totalorder %s2714_s26, %s2426_s23 }
  0x81   : > { %707 = vmatpush1.bf16.msra.mxu0 %v2183_v4  ;;  %750 = vmatpush1.bf16.msra.mxu1 %v2186_v6  ;;  %v2273_v4 = vld [vmem:[#allocation5 + $0x320] ss:$16 sps:$4 sm:$0xff]   ;;  %v2276_v6 = vld [vmem:[#allocation5 + $0x328] ss:$16 sps:$4 sm:$0xff]   ;;  %p2423_p6 = pnand %p2422_p4, %p2614_p12  ;;  %p2429_p13 = scmp.lt.s32.totalorder %s2427_s30, %s2421_s28 }
  0x82   : > { %708 = vmatprep.subr.bf16.mxu0 %v2191_v7  ;;  %751 = vmatprep.subr.bf16.mxu1 %v2194_v8  ;;  %v2281_v7 = vld [vmem:[#allocation5 + $0x344] ss:$16 sps:$4 sm:$0xff]   ;;  %v2284_v8 = vld [vmem:[#allocation5 + $0x34c] ss:$16 sps:$4 sm:$0xff]  }
  0x83   : > { %p2424_p8 = pneg %p2423_p6  ;;  %p2430_p3 = por %p2429_p13, %p2428_p10 }
  0x85   : > { %709 = vmatpush1.bf16.msra.mxu0 %v2189_v9  ;;  %752 = vmatpush1.bf16.msra.mxu1 %v2192_v10  ;;  %v2279_v9 = vld [vmem:[#allocation5 + $0x340] ss:$16 sps:$4 sm:$0xff]   ;;  %v2282_v10 = vld [vmem:[#allocation5 + $0x348] ss:$16 sps:$4 sm:$0xff]   ;;  %p2431_p7 = pnand %p2430_p3, %p2424_p8 }
  0x86   : > { %710 = vmatprep.subr.bf16.mxu0 %v2197_v11  ;;  %753 = vmatprep.subr.bf16.mxu1 %v2200_v12  ;;  %v2287_v11 = vld [vmem:[#allocation5 + $0x364] ss:$16 sps:$4 sm:$0xff]   ;;  %v2285_v12 = vld [vmem:[#allocation5 + $0x360] ss:$16 sps:$4 sm:$0xff]  }
  0x89   : > { %711 = vmatpush1.bf16.msra.mxu0 %v2195_v13  ;;  %754 = vmatpush1.bf16.msra.mxu1 %v2198_v14  ;;  %v2288_v13 = vld [vmem:[#allocation5 + $0x368] ss:$16 sps:$4 sm:$0xff]   ;;  %v2293_v14 = vld [vmem:[#allocation5 + $0x384] ss:$16 sps:$4 sm:$0xff]  }
  0x8a   : > { %712 = vmatprep.subr.bf16.mxu0 %v2203_v15  ;;  %755 = vmatprep.subr.bf16.mxu1 %v2206_v16  ;;  %v2296_v15 = vld [vmem:[#allocation5 + $0x38c] ss:$16 sps:$4 sm:$0xff]   ;;  %v2291_v16 = vld [vmem:[#allocation5 + $0x380] ss:$16 sps:$4 sm:$0xff]  }
  0x8d   : > { %713 = vmatpush1.bf16.msra.mxu0 %v2201_v17  ;;  %756 = vmatpush1.bf16.msra.mxu1 %v2204_v18  ;;  %v2294_v17 = vld [vmem:[#allocation5 + $0x388] ss:$16 sps:$4 sm:$0xff]   ;;  %v2299_v18 = vld [vmem:[#allocation5 + $0x3a4] ss:$16 sps:$4 sm:$0xff]  }
  0x8e   : > { %714 = vmatprep.subr.bf16.mxu0 %v2209_v19  ;;  %757 = vmatprep.subr.bf16.mxu1 %v2212_v20  ;;  %v2302_v19 = vld [vmem:[#allocation5 + $0x3ac] ss:$16 sps:$4 sm:$0xff]   ;;  %v2297_v20 = vld [vmem:[#allocation5 + $0x3a0] ss:$16 sps:$4 sm:$0xff]  }
  0x91   : > { %715 = vmatpush1.bf16.msra.mxu0 %v2207_v21  ;;  %758 = vmatpush1.bf16.msra.mxu1 %v2210_v22  ;;  %v2300_v21 = vld [vmem:[#allocation5 + $0x3a8] ss:$16 sps:$4 sm:$0xff]   ;;  %v2305_v22 = vld [vmem:[#allocation5 + $0x3c4] ss:$16 sps:$4 sm:$0xff]  }
  0x92   : > { %716 = vmatprep.subr.bf16.mxu0 %v2215_v23  ;;  %759 = vmatprep.subr.bf16.mxu1 %v2218_v24  ;;  %v2308_v23 = vld [vmem:[#allocation5 + $0x3cc] ss:$16 sps:$4 sm:$0xff]   ;;  %v2303_v24 = vld [vmem:[#allocation5 + $0x3c0] ss:$16 sps:$4 sm:$0xff]  }
  0x95   : > { %717 = vmatpush1.bf16.msra.mxu0 %v2213_v25  ;;  %760 = vmatpush1.bf16.msra.mxu1 %v2216_v26  ;;  %v2306_v25 = vld [vmem:[#allocation5 + $0x3c8] ss:$16 sps:$4 sm:$0xff]   ;;  %v2311_v26 = vld [vmem:[#allocation5 + $0x3e4] ss:$16 sps:$4 sm:$0xff]  }
  0x96   : > { %988 = vmatprep.subr.bf16.mxu0 %v2221_v27  ;;  %1031 = vmatprep.subr.bf16.mxu1 %v2224_v28  ;;  %v2314_v27 = vld [vmem:[#allocation5 + $0x3ec] ss:$16 sps:$4 sm:$0xff]   ;;  %v2309_v28 = vld [vmem:[#allocation5 + $0x3e0] ss:$16 sps:$4 sm:$0xff]  }
  0x98   : > { %1912 = vmatmul.mubr.msk.bf16.vlgmr.msra.gmra.mrb[0].mxu0 %vm1911_vm5, %v2679_v32  ;;  %1914 = vmatmul.mubr.msk.bf16.vlgmr.msra.gmra.mrb[0].mxu1 %vm1911_vm5, %v2679_v32  ;;  %v2242_v32 = vld [vmem:[#allocation5 + $0x26c] ss:$16 sps:$4 sm:$0xff]  }
  0x99   : > { %989 = vmatpush1.bf16.msra.mxu0 %v2219_v29  ;;  %1032 = vmatpush1.bf16.msra.mxu1 %v2222_v30  ;;  %v2312_v29 = vld [vmem:[#allocation5 + $0x3e8] ss:$16 sps:$4 sm:$0xff]   ;;  %v2317_v30 = vld [vmem:[#allocation5 + $0x404] ss:$16 sps:$4 sm:$0xff]  }
  0x9a   : > { %990 = vmatprep.subr.bf16.mxu0 %v2227_v31  ;;  %1033 = vmatprep.subr.bf16.mxu1 %v2230_v33  ;;  %v2320_v31 = vld [vmem:[#allocation5 + $0x40c] ss:$16 sps:$4 sm:$0xff]   ;;  %v2315_v33 = vld [vmem:[#allocation5 + $0x400] ss:$16 sps:$4 sm:$0xff]  }
  0x9b   : > { %1020 = vmatprep.mubr.bf16.mxu0 %v2499_v0  ;;  %1063 = vmatprep.mubr.bf16.mxu1 %v2499_v0 }
  0x9d   : > { %991 = vmatpush1.bf16.msra.mxu0 %v2225_v34  ;;  %1034 = vmatpush1.bf16.msra.mxu1 %v2228_v35  ;;  %v2318_v34 = vld [vmem:[#allocation5 + $0x408] ss:$16 sps:$4 sm:$0xff]   ;;  %v2323_v35 = vld [vmem:[#allocation5 + $0x424] ss:$16 sps:$4 sm:$0xff]  }
  0x9e   : > { %992 = vmatprep.subr.bf16.mxu0 %v2233_v36  ;;  %1035 = vmatprep.subr.bf16.mxu1 %v2236_v37  ;;  %v2326_v36 = vld [vmem:[#allocation5 + $0x42c] ss:$16 sps:$4 sm:$0xff]   ;;  %v2321_v37 = vld [vmem:[#allocation5 + $0x420] ss:$16 sps:$4 sm:$0xff]  }
  0xa1   : > { %993 = vmatpush1.bf16.msra.mxu0 %v2231_v38  ;;  %1036 = vmatpush1.bf16.msra.mxu1 %v2234_v39  ;;  %v2324_v38 = vld [vmem:[#allocation5 + $0x428] ss:$16 sps:$4 sm:$0xff]   ;;  %v2329_v39 = vld [vmem:[#allocation5 + $0x444] ss:$16 sps:$4 sm:$0xff]  }
  0xa2   : > { %994 = vmatprep.subr.bf16.mxu0 %v2239_v40  ;;  %1037 = vmatprep.subr.bf16.mxu1 %v2242_v32  ;;  %v2332_v40 = vld [vmem:[#allocation5 + $0x44c] ss:$16 sps:$4 sm:$0xff]   ;;  %v2327_v32 = vld [vmem:[#allocation5 + $0x440] ss:$16 sps:$4 sm:$0xff]  }
  0xa5   : > { %995 = vmatpush1.bf16.msra.mxu0 %v2237_v41  ;;  %1038 = vmatpush1.bf16.msra.mxu1 %v2240_v42  ;;  %v2330_v41 = vld [vmem:[#allocation5 + $0x448] ss:$16 sps:$4 sm:$0xff]   ;;  %v2335_v42 = vld [vmem:[#allocation5 + $0x464] ss:$16 sps:$4 sm:$0xff]  }
  0xa6   : > { %996 = vmatprep.subr.bf16.mxu0 %v2245_v43  ;;  %1039 = vmatprep.subr.bf16.mxu1 %v2248_v44  ;;  %v2333_v43 = vld [vmem:[#allocation5 + $0x460] ss:$16 sps:$4 sm:$0xff]   ;;  %v2336_v44 = vld [vmem:[#allocation5 + $0x468] ss:$16 sps:$4 sm:$0xff]  }
  0xa9   : > { %997 = vmatpush1.bf16.msra.mxu0 %v2243_v45  ;;  %1040 = vmatpush1.bf16.msra.mxu1 %v2246_v46  ;;  %v2341_v45 = vld [vmem:[#allocation5 + $0x484] ss:$16 sps:$4 sm:$0xff]   ;;  %v2344_v46 = vld [vmem:[#allocation5 + $0x48c] ss:$16 sps:$4 sm:$0xff]  }
  0xaa   : > { %998 = vmatprep.subr.bf16.mxu0 %v2251_v47  ;;  %1041 = vmatprep.subr.bf16.mxu1 %v2254_v48  ;;  %v2339_v47 = vld [vmem:[#allocation5 + $0x480] ss:$16 sps:$4 sm:$0xff]   ;;  %v2347_v48 = vld [vmem:[#allocation5 + $0x4a4] ss:$16 sps:$4 sm:$0xff]  }
  0xad   : > { %999 = vmatpush1.bf16.msra.mxu0 %v2249_v49  ;;  %1042 = vmatpush1.bf16.msra.mxu1 %v2252_v50  ;;  %v2350_v49 = vld [vmem:[#allocation5 + $0x4ac] ss:$16 sps:$4 sm:$0xff]   ;;  %v2345_v50 = vld [vmem:[#allocation5 + $0x4a0] ss:$16 sps:$4 sm:$0xff]  }
  0xae   : > { %1000 = vmatprep.subr.bf16.mxu0 %v2257_v51  ;;  %1043 = vmatprep.subr.bf16.mxu1 %v2260_v52  ;;  %v2348_v51 = vld [vmem:[#allocation5 + $0x4a8] ss:$16 sps:$4 sm:$0xff]   ;;  %v2353_v52 = vld [vmem:[#allocation5 + $0x4c4] ss:$16 sps:$4 sm:$0xff]  }
  0xb1   : > { %1001 = vmatpush1.bf16.msra.mxu0 %v2255_v54  ;;  %1044 = vmatpush1.bf16.msra.mxu1 %v2258_v55  ;;  %v2356_v54 = vld [vmem:[#allocation5 + $0x4cc] ss:$16 sps:$4 sm:$0xff]   ;;  %v2351_v55 = vld [vmem:[#allocation5 + $0x4c0] ss:$16 sps:$4 sm:$0xff]  }
  0xb2   : > { %1002 = vmatprep.subr.bf16.mxu0 %v2263_v56  ;;  %1045 = vmatprep.subr.bf16.mxu1 %v2266_v57  ;;  %v2354_v56 = vld [vmem:[#allocation5 + $0x4c8] ss:$16 sps:$4 sm:$0xff]   ;;  %v2359_v57 = vld [vmem:[#allocation5 + $0x4e4] ss:$16 sps:$4 sm:$0xff]  }
  0xb5   : > { %1003 = vmatpush1.bf16.msra.mxu0 %v2261_v58  ;;  %1046 = vmatpush1.bf16.msra.mxu1 %v2264_v59  ;;  %v2362_v58 = vld [vmem:[#allocation5 + $0x4ec] ss:$16 sps:$4 sm:$0xff]   ;;  %v2357_v59 = vld [vmem:[#allocation5 + $0x4e0] ss:$16 sps:$4 sm:$0xff]  }
  0xb6   : > { %1286 = vmatprep.subr.bf16.mxu0 %v2269_v60  ;;  %1329 = vmatprep.subr.bf16.mxu1 %v2272_v61  ;;  %v2360_v60 = vld [vmem:[#allocation5 + $0x4e8] ss:$16 sps:$4 sm:$0xff]   ;;  %v1674_v61 = vlaneseq }
  0xb8   : > { %1021 = vmatmul.mubr.bf16.vlgmr.msra.gmra.mrb[0].mxu0 %v2685_v53  ;;  %1064 = vmatmul.mubr.bf16.vlgmr.msra.gmra.mrb[0].mxu1 %v2685_v53  ;;  %v2290_v53 = vld [vmem:[#allocation5 + $0x36c] ss:$16 sps:$4 sm:$0xff]  }
  0xb9   : > { %1287 = vmatpush1.bf16.msra.mxu0 %v2267_v62  ;;  %1330 = vmatpush1.bf16.msra.mxu1 %v2270_v63  ;;  %v1675_v62 = vshrl.u32 %v1674_v61, 7 }
  0xba   : > { %1288 = vmatprep.subr.bf16.mxu0 %v2275_v1  ;;  %1331 = vmatprep.subr.bf16.mxu1 %v2278_v2  ;;  %v1672_v2 = vld [vmem:[%s2765_s2] sm:$0xf] }
  0xbb   : > { %1318 = vmatprep.mubr.bf16.mxu0 %v2499_v0  ;;  %1361 = vmatprep.mubr.bf16.mxu1 %v2499_v0  ;;  %v1676_v63 = vsub.s32 0, %v1675_v62  ;;  %v1684_v1 = vsub.s32 2, %v1675_v62 }
  0xbd   : > { %1289 = vmatpush1.bf16.msra.mxu0 %v2273_v4  ;;  %1332 = vmatpush1.bf16.msra.mxu1 %v2276_v6  ;;  %v1680_v4 = vsub.s32 1, %v1675_v62  ;;  %v1688_v6 = vsub.s32 3, %v1675_v62 }
  0xbe   : > { %1290 = vmatprep.subr.bf16.mxu0 %v2281_v7  ;;  %1333 = vmatprep.subr.bf16.mxu1 %v2284_v8  ;;  %v1677_v7 = vrot.slane %v1672_v2, %v1676_v63  ;;  %v1685_v8 = vrot.slane %v1672_v2, %v1684_v1 }
  0xc1   : > { %1291 = vmatpush1.bf16.msra.mxu0 %v2279_v9  ;;  %1334 = vmatpush1.bf16.msra.mxu1 %v2282_v10  ;;  %v1681_v9 = vrot.slane %v1672_v2, %v1680_v4  ;;  %v1689_v10 = vrot.slane %v1672_v2, %v1688_v6 }
  0xc2   : > { %1292 = vmatprep.subr.bf16.mxu0 %v2287_v11  ;;  %1335 = vmatprep.subr.bf16.mxu1 %v2290_v53 }
  0xc5   : > { %1293 = vmatpush1.bf16.msra.mxu0 %v2285_v12  ;;  %1336 = vmatpush1.bf16.msra.mxu1 %v2288_v13 }
  0xc6   : > { %1294 = vmatprep.subr.bf16.mxu0 %v2293_v14  ;;  %1337 = vmatprep.subr.bf16.mxu1 %v2296_v15 }
  0xc9   : > { %1295 = vmatpush1.bf16.msra.mxu0 %v2291_v16  ;;  %1338 = vmatpush1.bf16.msra.mxu1 %v2294_v17 }
  0xca   : > { %1296 = vmatprep.subr.bf16.mxu0 %v2299_v18  ;;  %1339 = vmatprep.subr.bf16.mxu1 %v2302_v19 }
  0xcd   : > { %1297 = vmatpush1.bf16.msra.mxu0 %v2297_v20  ;;  %1340 = vmatpush1.bf16.msra.mxu1 %v2300_v21 }
  0xce   : > { %1298 = vmatprep.subr.bf16.mxu0 %v2305_v22  ;;  %1341 = vmatprep.subr.bf16.mxu1 %v2308_v23 }
  0xd1   : > { %1299 = vmatpush1.bf16.msra.mxu0 %v2303_v24  ;;  %1342 = vmatpush1.bf16.msra.mxu1 %v2306_v25 }
  0xd2   : > { %1300 = vmatprep.subr.bf16.mxu0 %v2311_v26  ;;  %1343 = vmatprep.subr.bf16.mxu1 %v2314_v27 }
  0xd5   : > { %1301 = vmatpush1.bf16.msra.mxu0 %v2309_v28  ;;  %1344 = vmatpush1.bf16.msra.mxu1 %v2312_v29 }
  0xd6   : > { %1578 = vmatprep.subr.bf16.mxu0 %v2317_v30  ;;  %1621 = vmatprep.subr.bf16.mxu1 %v2320_v31 }
  0xd8   : > { %1319 = vmatmul.mubr.bf16.vlgmr.msra.gmra.mrb[0].mxu0 %v2692_v5  ;;  %1362 = vmatmul.mubr.bf16.vlgmr.msra.gmra.mrb[0].mxu1 %v2692_v5  ;;  %v2338_v5 = vld [vmem:[#allocation5 + $0x46c] ss:$16 sps:$4 sm:$0xff]  }
  0xd9   : > { %1579 = vmatpush1.bf16.msra.mxu0 %v2315_v33  ;;  %1622 = vmatpush1.bf16.msra.mxu1 %v2318_v34 }
  0xda   : > { %1580 = vmatprep.subr.bf16.mxu0 %v2323_v35  ;;  %1623 = vmatprep.subr.bf16.mxu1 %v2326_v36 }
  0xdb   : > { %1610 = vmatprep.mubr.bf16.mxu0 %v2499_v0  ;;  %1653 = vmatprep.mubr.bf16.mxu1 %v2499_v0  ;;  %v2342_v0 = vld [vmem:[#allocation5 + $0x488] ss:$16 sps:$4 sm:$0xff]  }
  0xdd   : > { %1581 = vmatpush1.bf16.msra.mxu0 %v2321_v37  ;;  %1624 = vmatpush1.bf16.msra.mxu1 %v2324_v38 }
  0xde   : > { %1582 = vmatprep.subr.bf16.mxu0 %v2329_v39  ;;  %1625 = vmatprep.subr.bf16.mxu1 %v2332_v40 }
  0xe1   : > { %1583 = vmatpush1.bf16.msra.mxu0 %v2327_v32  ;;  %1626 = vmatpush1.bf16.msra.mxu1 %v2330_v41 }
  0xe2   : > { %1584 = vmatprep.subr.bf16.mxu0 %v2335_v42  ;;  %1627 = vmatprep.subr.bf16.mxu1 %v2338_v5 }
  0xe5   : > { %1585 = vmatpush1.bf16.msra.mxu0 %v2333_v43  ;;  %1628 = vmatpush1.bf16.msra.mxu1 %v2336_v44 }
  0xe6   : > { %1586 = vmatprep.subr.bf16.mxu0 %v2341_v45  ;;  %1629 = vmatprep.subr.bf16.mxu1 %v2344_v46 }
  0xe9   : > { %1587 = vmatpush1.bf16.msra.mxu0 %v2339_v47  ;;  %1630 = vmatpush1.bf16.msra.mxu1 %v2342_v0 }
  0xea   : > { %1588 = vmatprep.subr.bf16.mxu0 %v2347_v48  ;;  %1631 = vmatprep.subr.bf16.mxu1 %v2350_v49 }
  0xed   : > { %1589 = vmatpush1.bf16.msra.mxu0 %v2345_v50  ;;  %1632 = vmatpush1.bf16.msra.mxu1 %v2348_v51 }
  0xee   : > { %1590 = vmatprep.subr.bf16.mxu0 %v2353_v52  ;;  %1633 = vmatprep.subr.bf16.mxu1 %v2356_v54 }
  0xf1   : > { %1591 = vmatpush1.bf16.msra.mxu0 %v2351_v55  ;;  %1634 = vmatpush1.bf16.msra.mxu1 %v2354_v56 }
  0xf2   : > { %1592 = vmatprep.subr.bf16.mxu0 %v2359_v57  ;;  %1635 = vmatprep.subr.bf16.mxu1 %v2362_v58 }
  0xf5   : > { %1593 = vmatpush1.bf16.msra.mxu0 %v2357_v59  ;;  %1636 = vmatpush1.bf16.msra.mxu1 %v2360_v60 }
  0xf8   : > { %1611 = vmatmul.mubr.bf16.vlgmr.msra.gmra.mrb[0].mxu0 %v2689_v3  ;;  %1654 = vmatmul.mubr.bf16.vlgmr.msra.gmra.mrb[0].mxu1 %v2689_v3 }
 0x1cb   : > { %v1612_v11 = vpop.f32.mrb[0].mxu0  ;;  %v1655_v53 = vpop.f32.mrb[0].mxu1 }
 0x1cc   : > { %v1694_v12 = vadd.f32 %v1677_v7, %v1612_v11  ;;  %v1696_v13 = vadd.f32 %v1685_v8, %v1655_v53  ;;  %v1614_v3 = vpop.f32.mrb[1].mxu0  ;;  %v1657_v14 = vpop.f32.mrb[1].mxu1 }
 0x1cd   : > { %v1695_v15 = vadd.f32 %v1681_v9, %v1614_v3  ;;  %v1697_v16 = vadd.f32 %v1689_v10, %v1657_v14  ;;  %v1616_v17 = vpop.f32.mrb[2].mxu0  ;;  %v1659_v18 = vpop.f32.mrb[2].mxu1 }
 0x1ce   : > { %v1702_v19 = vmax.f32 %v1694_v12, 0.0  ;;  %v1704_v20 = vmax.f32 %v1696_v13, 0.0  ;;  %v1698_v21 = vadd.f32 %v1677_v7, %v1616_v17  ;;  %v1700_v22 = vadd.f32 %v1685_v8, %v1659_v18  ;;  %v1618_v23 = vpop.f32.mrb[3].mxu0  ;;  %v1661_v24 = vpop.f32.mrb[3].mxu1 }
 0x1cf   : > { %v1703_v25 = vmax.f32 %v1695_v15, 0.0  ;;  %v1705_v26 = vmax.f32 %v1697_v16, 0.0  ;;  %v1699_v27 = vadd.f32 %v1681_v9, %v1618_v23  ;;  %v1701_v28 = vadd.f32 %v1689_v10, %v1661_v24 }
 0x1d0   : > { %v1706_v29 = vmax.f32 %v1698_v21, 0.0  ;;  %v1708_v30 = vmax.f32 %v1700_v22, 0.0 }
 0x1d1   : > { %v2021_v31 = vpack.c.bf16 %v1703_v25, %v1702_v19  ;;  %v2022_v33 = vpack.c.bf16 %v1705_v26, %v1704_v20  ;;  %v1707_v34 = vmax.f32 %v1699_v27, 0.0  ;;  %v1709_v35 = vmax.f32 %v1701_v28, 0.0 }
 0x1d3   : > { %1734 = vst [vmem:[%s203_s25] sm:$0xff] %v2021_v31  ;;  %1735 = vst [vmem:[%s203_s25 + $0x8] sm:$0xff] %v2022_v33  ;;  %v2023_v36 = vpack.c.bf16 %v1707_v34, %v1706_v29  ;;  %v2024_v37 = vpack.c.bf16 %v1709_v35, %v1708_v30 }
 0x1d5   : > { %1736 = vst [vmem:[%s203_s25 + $0x10] sm:$0xff] %v2023_v36  ;;  %1737 = vst [vmem:[%s203_s25 + $0x18] sm:$0xff] %v2024_v37 }
 0x1d6   : > { %2434 = shalt.err (!%p2431_p7)
}
 0x1d7   : > { %s2435_s22 = scalar_lea.hbm %s2719_s27, 512  ;;  %s2439_s9 = scalar_lea.hbm %s2766_s3, 1024 }
 0x1d8   : > { %p2436_p9 = scmp.ne.s32.totalorder %s2719_s27, %s2435_s22  ;;  %p2440_p5 = scmp.lt.u32.totalorder %s2719_s27, %s2766_s3 }
 0x1d9   : > { %p2441_p11 = scmp.lt.u32.totalorder %s2439_s9, %s2435_s22  ;;  %p2443_p4 = scmp.lt.u32.totalorder %s2435_s22, %s2719_s27 }
 0x1da   : > { %p2437_p2 = pnand %p2436_p9, %p2614_p12 }
 0x1db   : > { %p2442_p1 = por %p2441_p11, %p2440_p5 }
 0x1dc   : > { %p2438_p0 = pneg %p2437_p2 }
 0x1dd   : > { %p2444_p6 = por %p2443_p4, %p2442_p1 }
 0x1df   : > { %p2445_p8 = pnand %p2444_p6, %p2438_p0 }
 0x1e1   : > { %2448 = shalt.err (!%p2445_p8)
}
 0x1e2   : > { %s2501_s4 = smov 256   ;;  %s2502_s25 = smov 16  }
 0x1e3   : > { %2064 = dma.vmem_to_hbm [thread:$0]  (%p2614_p12), %s2714_s26, 512, %s2719_s27, %s1739_s16, %s2501_s4, %s2501_s4, %s2502_s25  }
 0x1e4 PF: > { %s1767_s5 = sand.u32 1, %s2479_s12   ;;  %p2781_p10 = scmp.ne.s32.totalorder %s2771_s19, 0 }
 0x1e5   : > { %p2782_p13 = scmp.ge.s32.totalorder %s2491_s15, 2  ;;  %s1768_s10 = scalar_lea.sflag [#allocation4], %s1767_s5 }
 0x1e7   : > { %p2075_p3 = pnand %p2782_p13, %p2781_p10 }
 0x1e9   : > { %2474 = dma.done.wait (!%p2075_p3), %s1768_s10, 512  }
 0x1ea   : > { %2476 = vsyncadd (!%p2075_p3), %s1768_s10, 4294966784  ;;  %p17_p7 = scmp.ge.s32.totalorder %s2579_s24, 4   ;;  %s2783_s12 = smov %s2483_s13 }
 0x1eb   : > { %s2784_s13 = smov %s2487_s14  ;;  %s2785_s14 = smov %s2610_s17 }
 0x1ec   : > { %s2786_s15 = smov %s2579_s24  ;;  %19 = sbr.rel (!%p17_p7) target bundleno = 6 (0x6), region = 85 }
 0x1f3   :  { %1773 = vsyncpa [#allocation3], 1 }
 0x1f4   :  { %1775 = vsyncpa [#allocation3 + $0x1], 1 }
 0x1f5   :  { %1776 = vsyncpa [#allocation6], 1 }
 0x1f6   :  { %1777 = vsyncpa [#allocation4], 1 }
 0x1f7   :  { %1779 = vsyncpa [#allocation4 + $0x1], 1 }

</bundles_post_ra>
